<compile_context>
chip_gen: v7x
topology: tpu7x:2x2x1
jax: 0.10.0
libtpu: 0.0.40
codegen_flags: <defaults>
</compile_context>

<pallas_src>
import functools

import jax
import jax.numpy as jnp
from jax.experimental import pallas as pl
from jax.experimental.pallas import tpu as pltpu

LANES = 128


def _cdiv(a, b):
    return -(-a // b)


def _pick_sub_rows(tm):
    """Largest sub-tile height in {64,32,16,8} dividing tm (tm is a mult of 8)."""
    for s in (64, 32, 16, 8):
        if tm % s == 0:
            return s
    return 8


# ---------------------------------------------------------------------------
# One-time probe: can this backend shard the grid across TensorCores?
# (CORE_PARALLEL is the v7x dual-TC lever; PARALLEL elsewhere.)
# ---------------------------------------------------------------------------
_SEM_CACHE = []


def _streaming_grid_semantics():
    if _SEM_CACHE:
        return _SEM_CACHE[0]
    sem = getattr(pltpu, "PARALLEL", "parallel")
    core_parallel = getattr(pltpu, "CORE_PARALLEL", None)
    if core_parallel is not None:
        def _probe_kernel(x_ref, o_ref):
            o_ref[...] = x_ref[...] + 1.0
        try:
            probe = pl.pallas_call(
                _probe_kernel,
                out_shape=jax.ShapeDtypeStruct((24, LANES), jnp.float32),
                grid_spec=pltpu.PrefetchScalarGridSpec(
                    num_scalar_prefetch=0,
                    grid=(3,),  # odd on purpose: catches divisibility limits
                    in_specs=[pl.BlockSpec((8, LANES), lambda i: (i, 0))],
                    out_specs=pl.BlockSpec((8, LANES), lambda i: (i, 0)),
                ),
                compiler_params=pltpu.CompilerParams(
                    dimension_semantics=(core_parallel,)),
            )
            with jax.ensure_compile_time_eval():
                y = jax.block_until_ready(
                    probe(jnp.zeros((24, LANES), jnp.float32)))
                if bool(jnp.allclose(y, 1.0)):
                    sem = core_parallel
        except Exception:
            sem = getattr(pltpu, "PARALLEL", "parallel")
    _SEM_CACHE.append(sem)
    return sem


# ---------------------------------------------------------------------------
# Kernel
# ---------------------------------------------------------------------------
def _bce_blur_kernel(pred_ref, true_ref, out_ref, *, inv_alpha, rem, sub_rows):
    tm = pred_ref.shape[0]
    n_sub = tm // sub_rows
    block_elems = tm * LANES

    if rem is not None:
        # Only the last grid step can contain padded / out-of-bounds lanes.
        is_last = pl.program_id(0) == pl.num_programs(0) - 1
        limit = jnp.where(is_last, jnp.int32(rem), jnp.int32(block_elems))
        base_idx = (
            jax.lax.broadcasted_iota(jnp.int32, (sub_rows, LANES), 0) * LANES
            + jax.lax.broadcasted_iota(jnp.int32, (sub_rows, LANES), 1))

    def sub_body(j, acc):
        r0 = pl.multiple_of(j * sub_rows, sub_rows)
        x = pred_ref[pl.ds(r0, sub_rows), :].astype(jnp.float32)   # logits
        y = true_ref[pl.ds(r0, sub_rows), :].astype(jnp.float32)   # targets

        # BCEWithLogitsLoss(reduction='none'): max(x,0) - x*y + log1p(exp(-|x|))
        bce = jnp.maximum(x, 0.0) - x * y + jnp.log1p(jnp.exp(-jnp.abs(x)))
        # sigmoid via a single EUP tanh (no second exp, no Newton/select).
        p = 0.5 * jnp.tanh(0.5 * x) + 0.5
        alpha_factor = 1.0 - jnp.exp((p - y - 1.0) * inv_alpha)
        loss = bce * alpha_factor

        if rem is not None:
            idx = base_idx + r0 * LANES
            loss = jnp.where(idx < limit, loss, 0.0)

        # (sub_rows,128) -> (8,128) with pure VPU adds; accumulate in f32.
        return acc + loss.reshape(sub_rows // 8, 8, LANES).sum(axis=0)

    out_ref[...] = jax.lax.fori_loop(
        0, n_sub, sub_body, jnp.zeros((8, LANES), jnp.float32))


# ---------------------------------------------------------------------------
# Wrapper
# ---------------------------------------------------------------------------
def bce_blur_with_logits_loss(pred, true, alpha=0.05, block_rows=1024):
    """BCEBlurWithLogitsLoss forward: scalar mean loss (matches the nn.Module)."""
    if pred.shape != true.shape:
        raise ValueError("pred and true must have the same shape")
    n = int(pred.size)
    inv_alpha = float(1.0 / (alpha + 1e-4))

    pf = pred.reshape(-1)
    tf = true.reshape(-1)

    rows = max(_cdiv(n, LANES), 8)
    flat_len = rows * LANES
    if flat_len != n:
        # Only hit when n % 128 != 0 (lane alignment) or n < 1024 (tiny input).
        # The common 128-divisible case takes the zero-copy reshape below.
        # TODO(synk): a zero-copy path for n % 128 != 0 would need a manual-DMA
        # (pl.ANY) kernel with unaligned 1-D windows.
        pf = jnp.pad(pf, (0, flat_len - n))
        tf = jnp.pad(tf, (0, flat_len - n))
    pf = pf.reshape(rows, LANES)   # free row-major reshape (no data movement)
    tf = tf.reshape(rows, LANES)

    # Tile height: multiple of 8, <= rows, capped so the double-buffered
    # working set (2 inputs x 2 bufs) stays well inside v7x's VMEM.
    block_rows = max(8, min(int(block_rows), 4096))
    block_rows = (block_rows // 8) * 8
    tm = min(block_rows, (rows // 8) * 8)
    grid = _cdiv(rows, tm)                      # ragged last block allowed

    # Valid (unpadded, in-bounds) elements in the final grid block.
    rem = n - (grid - 1) * tm * LANES
    rem_arg = None if rem == tm * LANES else int(rem)

    kernel = functools.partial(
        _bce_blur_kernel,
        inv_alpha=inv_alpha,
        rem=rem_arg,
        sub_rows=_pick_sub_rows(tm),
    )

    partials = pl.pallas_call(
        kernel,
        out_shape=jax.ShapeDtypeStruct((grid * 8, LANES), jnp.float32),
        grid_spec=pltpu.PrefetchScalarGridSpec(
            num_scalar_prefetch=0,
            grid=(grid,),
            in_specs=[
                pl.BlockSpec((tm, LANES), lambda i: (i, 0)),
                pl.BlockSpec((tm, LANES), lambda i: (i, 0)),
            ],
            out_specs=pl.BlockSpec((8, LANES), lambda i: (i, 0)),
        ),
        compiler_params=pltpu.CompilerParams(
            dimension_semantics=(_streaming_grid_semantics(),),
        ),
    )(pf, tf)

    # Tiny final reduction + mean in plain JAX.
    return jnp.sum(partials) / jnp.float32(n)


def _reference(pred, true, alpha=0.05):
    x = pred.astype(jnp.float32)
    y = true.astype(jnp.float32)
    loss = jnp.maximum(x, 0.0) - x * y + jnp.log1p(jnp.exp(-jnp.abs(x)))
    p = jax.nn.sigmoid(x)
    dx = p - y
    alpha_factor = 1.0 - jnp.exp((dx - 1.0) / (alpha + 1e-4))
    return jnp.mean(loss * alpha_factor)


if __name__ == "__main__":
    key = jax.random.PRNGKey(0)
    k1, k2 = jax.random.split(key)
    # pred: raw logits; true: targets in [0, 1]   (NCHW-style shape)
    pred = jax.random.normal(k1, (2, 4, 16, 16), dtype=jnp.float32)
    true = (jax.random.uniform(k2, (2, 4, 16, 16)) > 0.5).astype(jnp.float32)

    loss_fn = jax.jit(functools.partial(bce_blur_with_logits_loss, alpha=0.05))
    out = jax.block_until_ready(loss_fn(pred, true))

    ref = _reference(pred, true, alpha=0.05)
    assert jnp.allclose(out, ref, rtol=1e-3, atol=1e-6), (out, ref)
    print("KERNEL_OK")
</pallas_src>

<mosaic_0001>
module attributes {stable_mosaic.version = 11 : i64} {
  func.func @_bce_blur_kernel(%arg0: i32, %arg1: memref<16x128xf32, #tpu.memory_space<vmem>>, %arg2: memref<16x128xf32, #tpu.memory_space<vmem>>, %arg3: memref<8x128xf32, #tpu.memory_space<vmem>>) attributes {dimension_semantics = [#tpu.dimension_semantics<parallel>], iteration_bounds = array<i64: 1>, scalar_prefetch = 0 : i64, scratch_operands = 0 : i64, tpu.core_type = #tpu.core_type<tc>, window_params = [{transform_indices = @transform_0, window_bounds = array<i64: 16, 128>}, {transform_indices = @transform_1, window_bounds = array<i64: 16, 128>}, {transform_indices = @transform_2, window_bounds = array<i64: 8, 128>}]} {
    %cst = arith.constant 0.000000e+00 : f32
    %0 = vector.broadcast %cst : f32 to vector<8x128xf32>
    %c0_i32 = arith.constant 0 : i32
    %c16_i32 = arith.constant 16 : i32
    %1 = arith.muli %c0_i32, %c16_i32 : i32
    %2 = tpu.assume_multiple %1, 16 : i32
    %3 = arith.index_cast %2 : i32 to index
    %c0 = arith.constant 0 : index
    %4 = vector.load %arg1[%3, %c0] : memref<16x128xf32, #tpu.memory_space<vmem>>, vector<16x128xf32>
    %5 = arith.index_cast %2 : i32 to index
    %c0_0 = arith.constant 0 : index
    %6 = vector.load %arg2[%5, %c0_0] : memref<16x128xf32, #tpu.memory_space<vmem>>, vector<16x128xf32>
    %cst_1 = arith.constant 0.000000e+00 : f32
    %7 = vector.broadcast %cst_1 : f32 to vector<16x128xf32>
    %8 = arith.maximumf %4, %7 : vector<16x128xf32>
    %9 = arith.mulf %4, %6 : vector<16x128xf32>
    %10 = arith.subf %8, %9 : vector<16x128xf32>
    %11 = math.absf %4 : vector<16x128xf32>
    %cst_2 = arith.constant 0.000000e+00 : f32
    %12 = vector.broadcast %cst_2 : f32 to vector<16x128xf32>
    %13 = arith.subf %12, %11 : vector<16x128xf32>
    %14 = math.exp %13 : vector<16x128xf32>
    %15 = math.log1p %14 : vector<16x128xf32>
    %16 = arith.addf %10, %15 : vector<16x128xf32>
    %cst_3 = arith.constant 5.000000e-01 : f32
    %17 = vector.broadcast %cst_3 : f32 to vector<16x128xf32>
    %18 = arith.mulf %17, %4 : vector<16x128xf32>
    %19 = math.tanh %18 : vector<16x128xf32>
    %cst_4 = arith.constant 5.000000e-01 : f32
    %20 = vector.broadcast %cst_4 : f32 to vector<16x128xf32>
    %21 = arith.mulf %20, %19 : vector<16x128xf32>
    %cst_5 = arith.constant 5.000000e-01 : f32
    %22 = vector.broadcast %cst_5 : f32 to vector<16x128xf32>
    %23 = arith.addf %21, %22 : vector<16x128xf32>
    %24 = arith.subf %23, %6 : vector<16x128xf32>
    %cst_6 = arith.constant 1.000000e+00 : f32
    %25 = vector.broadcast %cst_6 : f32 to vector<16x128xf32>
    %26 = arith.subf %24, %25 : vector<16x128xf32>
    %cst_7 = arith.constant 19.9600792 : f32
    %27 = vector.broadcast %cst_7 : f32 to vector<16x128xf32>
    %28 = arith.mulf %26, %27 : vector<16x128xf32>
    %29 = math.exp %28 : vector<16x128xf32>
    %cst_8 = arith.constant 1.000000e+00 : f32
    %30 = vector.broadcast %cst_8 : f32 to vector<16x128xf32>
    %31 = arith.subf %30, %29 : vector<16x128xf32>
    %32 = arith.mulf %16, %31 : vector<16x128xf32>
    %33 = vector.shape_cast %32 : vector<16x128xf32> to vector<2x8x128xf32>
    %cst_9 = arith.constant dense<0.000000e+00> : vector<8x128xf32>
    %34 = vector.multi_reduction <add>, %33, %cst_9 [0] : vector<2x8x128xf32> to vector<8x128xf32>
    %35 = arith.addf %0, %34 : vector<8x128xf32>
    %c1_i32 = arith.constant 1 : i32
    %c0_10 = arith.constant 0 : index
    %c0_11 = arith.constant 0 : index
    %36 = vector.load %arg3[%c0_10, %c0_11] : memref<8x128xf32, #tpu.memory_space<vmem>>, vector<8x128xf32>
    tpu.vector_store %arg3[%c0_10, %c0_11], %35 {strides = array<i32>} : memref<8x128xf32, #tpu.memory_space<vmem>>, vector<8x128xf32>,
    return
  }
  func.func @transform_0(%arg0: i32) -> (i32, i32) {
    %c0_i32 = arith.constant 0 : i32
    %c0_i32_0 = arith.constant 0 : i32
    return %arg0, %c0_i32 : i32, i32
  }
  func.func @transform_1(%arg0: i32) -> (i32, i32) {
    %c0_i32 = arith.constant 0 : i32
    %c0_i32_0 = arith.constant 0 : i32
    return %arg0, %c0_i32 : i32, i32
  }
  func.func @transform_2(%arg0: i32) -> (i32, i32) {
    %c0_i32 = arith.constant 0 : i32
    %c0_i32_0 = arith.constant 0 : i32
    return %arg0, %c0_i32 : i32, i32
  }
}

</mosaic_0001>

<bundles_post_ra>
// kernel: bce_blur_with_logits_loss.1
= control target key start
LH: loop header
LB: loop body
LE: loop exit
PB: predicated region body
PF: predicated region fallthrough
CT: control target
= control target key end

     0   :  { %s126_s0 = inlined_call_operand.vmem [shape: f32[16,128], index: 0, kind: input, shape index: {}]   ;;  %s127_s1 = inlined_call_operand.vmem [shape: f32[16,128], index: 1, kind: input, shape index: {}]   ;;  %s128_s2 = inlined_call_operand.vmem [shape: f32[8,128], index: 2, kind: output, shape index: {}]  }
   0x1   :  { %v11_v0 = vld [vmem:[%s126_s0] sm:$0xff]  ;;  %v12_v1 = vld [vmem:[%s126_s0 + $0x8] sm:$0xff] }
   0x2   :  { %v21_v2 = vand.u32 2147483647, %v11_v0  ;;  %v22_v3 = vand.u32 2147483647, %v12_v1  ;;  %v49_v4 = vmul.f32 0.5, %v11_v0  ;;  %v50_v5 = vmul.f32 0.5, %v12_v1 }
   0x3   :  { %v13_v13 = vld [vmem:[%s127_s1] sm:$0xff]  ;;  %v14_v16 = vld [vmem:[%s127_s1 + $0x8] sm:$0xff]  ;;  %v15_v36 = vmax.f32 %v11_v0, 0.0  ;;  %v16_v38 = vmax.f32 %v12_v1, 0.0 }
   0x4   :  { %v23_v6 = vsub.f32 0.0, %v21_v2  ;;  %v24_v7 = vsub.f32 0.0, %v22_v3  ;;  %80 = vtanh.f32 %v49_v4  ;;  %v17_v37 = vmul.f32 %v13_v13, %v11_v0 }
   0x5   :  { %82 = vtanh.f32 %v50_v5  ;;  %v18_v39 = vmul.f32 %v14_v16, %v12_v1 }
   0x6   :  { %v25_v8 = vmul.f32 1.442695, %v23_v6  ;;  %v27_v9 = vmul.f32 1.442695, %v24_v7  ;;  %v19_v45 = vsub.f32 %v15_v36, %v17_v37 }
   0x7   :  { %v20_v47 = vsub.f32 %v16_v38, %v18_v39 }
   0x8   :  { %84 = vpow2.f32 %v25_v8 }
   0x9   :  { %86 = vpow2.f32 %v27_v9 }
   0xe   :  { %v81_v10 = vpop.eup %80 }
   0xf   :  { %v83_v11 = vpop.eup %82  ;;  %v53_v12 = vmul.f32 0.5, %v81_v10 }
  0x10   :  { %v54_v14 = vmul.f32 0.5, %v83_v11 }
  0x11   :  { %v55_v17 = vadd.f32 0.5, %v53_v12 }
  0x12   :  { %v85_v15 = vpop.eup %84  ;;  %v56_v20 = vadd.f32 0.5, %v54_v14 }
  0x13   :  { %v87_v18 = vpop.eup %86  ;;  %v29_v19 = vadd.f32 1.0, %v85_v15  ;;  %v57_v22 = vsub.f32 %v55_v17, %v13_v13  ;;  %v32_v24 = vmul.f32 -0.5, %v85_v15  ;;  %v35_v32 = vand.u32 2147483647, %v85_v15 }
  0x14   :  { %v38_v21 = vadd.f32 1.0, %v87_v18  ;;  %v58_v23 = vsub.f32 %v56_v20, %v14_v16  ;;  %v41_v26 = vmul.f32 -0.5, %v87_v18  ;;  %v44_v35 = vand.u32 2147483647, %v87_v18 }
  0x15   :  { %88 = vlog2.f32 %v29_v19  ;;  %v78_v25 = vadd.f32 -1.0, %v57_v22  ;;  %v33_v30 = vadd.f32 1.0, %v32_v24  ;;  %vm36_vm0 = vcmp.lt.f32.partialorder %v35_v32, 0.0004427343 }
  0x16   :  { %90 = vlog2.f32 %v38_v21  ;;  %v79_v27 = vadd.f32 -1.0, %v58_v23  ;;  %v42_v33 = vadd.f32 1.0, %v41_v26  ;;  %vm45_vm1 = vcmp.lt.f32.partialorder %v44_v35, 0.0004427343 }
  0x17   :  { %v61_v28 = vmul.f32 19.96008, %v78_v25  ;;  %v34_v40 = vmul.f32 %v85_v15, %v33_v30 }
  0x18   :  { %v62_v29 = vmul.f32 19.96008, %v79_v27  ;;  %v43_v42 = vmul.f32 %v87_v18, %v42_v33 }
  0x19   :  { %v63_v31 = vmul.f32 1.442695, %v61_v28 }
  0x1a   :  { %v65_v34 = vmul.f32 1.442695, %v62_v29 }
  0x1b   :  { %92 = vpow2.f32 %v63_v31 }
  0x1c   :  { %94 = vpow2.f32 %v65_v34 }
  0x1f   :  { %v89_v41 = vpop.eup %88 }
  0x20   :  { %v91_v43 = vpop.eup %90  ;;  %v31_v44 = vmul.f32 0.6931472, %v89_v41 }
  0x21   :  { %v40_v46 = vmul.f32 0.6931472, %v91_v43 }
  0x22   :  { %v37_v48 = vsel %vm36_vm0, %v34_v40, %v31_v44 }
  0x23   :  { %v46_v49 = vsel %vm45_vm1, %v43_v42, %v40_v46  ;;  %v47_v50 = vadd.f32 %v37_v48, %v19_v45 }
  0x24   :  { %v48_v52 = vadd.f32 %v46_v49, %v20_v47 }
  0x25   :  { %v93_v51 = vpop.eup %92 }
  0x26   :  { %v95_v53 = vpop.eup %94  ;;  %v67_v54 = vsub.f32 1.0, %v93_v51 }
  0x27   :  { %v68_v55 = vsub.f32 1.0, %v95_v53 }
  0x28   :  { %v69_v56 = vmul.f32 %v67_v54, %v47_v50 }
  0x29   :  { %v70_v57 = vmul.f32 %v68_v55, %v48_v52 }
  0x2b   :  { %v71_v58 = vadd.f32 %v70_v57, %v69_v56 }
  0x2d   :  { %73 = vst [vmem:[%s128_s2] sm:$0xff] %v71_v58 }

</bundles_post_ra>
